<compile_context>
chip_gen: v7x
topology: tpu7x:2x2x1
jax: 0.10.0
libtpu: 0.0.40
codegen_flags: <defaults>
</compile_context>

<pallas_src>
import functools

import jax
import jax.numpy as jnp
from jax.experimental import pallas as pl
from jax.experimental.pallas import tpu as pltpu

LN_EPS = 1e-5  # torch.nn.LayerNorm default


def _round_up(x, m):
    return (x + m - 1) // m * m


def _cdiv(a, b):
    return -(-a // b)


def _ln_relu_tail(h, g_ref, beta_ref, inv_d_out, out_dtype, low_precision_tail):
    """LayerNorm (f32 stats over real Dout) + affine + ReLU; Dropout(p=0) = identity."""
    s1 = jnp.sum(h, axis=-1, keepdims=True)
    s2 = jnp.sum(h * h, axis=-1, keepdims=True)            # one-pass mean/var
    mean = s1 * inv_d_out
    # Clamp: one-pass variance can cancel slightly negative in f32 -> NaN in rsqrt.
    var = jnp.maximum(s2 * inv_d_out - mean * mean, 0.0)
    hn = (h - mean) * jax.lax.rsqrt(var + LN_EPS)           # rsqrt -> EUP slot
    g = g_ref[...]
    beta = beta_ref[...]
    if low_precision_tail and jnp.dtype(out_dtype).itemsize < 4:
        # bf16 VALU (v6e/v7x) packs 2 elems/lane -> shorter serial epilogue tail.
        hn, g, beta = hn.astype(out_dtype), g.astype(out_dtype), beta.astype(out_dtype)
    y = hn * g + beta                                       # padded gamma/beta = 0 -> stays 0
    # TODO(synk): training-mode dropout with p > 0 would need pltpu.prng_seed +
    #             pltpu.prng_random_bits; module default p=0.0 (and eval) is identity.
    return jnp.maximum(y, 0).astype(out_dtype)


def _single_k_kernel(x_ref, w_ref, b_ref, g_ref, beta_ref, o_ref, *,
                     inv_d_out, low_precision_tail):
    # Whole contraction in one MXU call: no accumulator scratch round-trip.
    h = jnp.dot(x_ref[...], w_ref[...], preferred_element_type=jnp.float32) + b_ref[...]
    o_ref[...] = _ln_relu_tail(h, g_ref, beta_ref, inv_d_out, o_ref.dtype,
                               low_precision_tail)


def _k_tiled_kernel(x_ref, w_ref, b_ref, g_ref, beta_ref, o_ref, acc_ref, *,
                    inv_d_out, low_precision_tail):
    # Grid: (row tiles [parallel], K tiles [reduction]).
    k = pl.program_id(1)
    part = jnp.dot(x_ref[...], w_ref[...], preferred_element_type=jnp.float32)

    @pl.when(k == 0)
    def _first():               # plain store: avoids zero-fill + read-modify-write
        acc_ref[...] = part

    @pl.when(k > 0)
    def _accum():
        acc_ref[...] += part

    @pl.when(k == pl.num_programs(1) - 1)
    def _epilogue():
        h = acc_ref[...] + b_ref[...]
        o_ref[...] = _ln_relu_tail(h, g_ref, beta_ref, inv_d_out, o_ref.dtype,
                                   low_precision_tail)


def _tpu_generation():
    try:
        kind = jax.devices()[0].device_kind.lower()
    except Exception:
        return 0
    for g in (7, 6, 5, 4):
        if f"v{g}" in kind:
            return g
    return 0


def drop_norm_lin(x, weight, bias, ln_gamma, ln_beta):
    """x: (B, L, Din); weight: (Dout, Din); bias/ln_gamma/ln_beta: (Dout,)."""
    B, L, Din = x.shape
    Dout = weight.shape[0]
    M = B * L
    in_dtype = x.dtype
    itemsize = jnp.dtype(in_dtype).itemsize
    out_itemsize = itemsize

    gen = _tpu_generation()
    # v5e/v6e: 128 MiB physical VMEM (cap ~100 MiB); v7x: 64 MiB (cap ~56 MiB to
    # leave Mosaic internal-scratch headroom). Unknown -> conservative.
    vmem_cap = 100 * 2**20 if gen in (5, 6) else 56 * 2**20
    low_precision_tail = gen != 5   # v5e has no bf16 VPU -> keep f32 tail there

    # ---- tiling plan (lane-dense: feature dims padded to multiples of 128) ----
    Dout_p = _round_up(Dout, 128)
    row_mult = 8 * max(1, 4 // itemsize)            # 8 f32, 16 bf16, 32 int8
    if Din <= 1024:
        tk = _round_up(Din, 128)                     # whole contraction in one K step
    else:
        tk = 1024 if Dout_p <= 2048 else 512         # K-tiled reduction

    # Row tile: <=512 rows per tile (amortizes the per-row-tile weight re-stream past
    # v6e's flops/byte breakeven) but >=2 row tiles whenever possible so both v7x
    # TensorCores get work; tiles sized to minimize row padding.
    n_row_tiles = max(1, _cdiv(M, 512))
    if n_row_tiles == 1 and M >= 2 * row_mult:
        n_row_tiles = 2
    tm = _round_up(_cdiv(M, n_row_tiles), row_mult)

    def _vmem_budget(tm_, tk_):
        k_tiled_ = _round_up(Din, tk_) // tk_ > 1
        b = (2 * tm_ * tk_ * itemsize               # x blocks (double-buffered)
             + 2 * tk_ * Dout_p * itemsize          # W^T blocks (double-buffered)
             + 2 * 3 * Dout_p * 4                   # bias / gamma / beta blocks
             + 2 * tm_ * Dout_p * out_itemsize      # output blocks
             + 4 * tm_ * Dout_p * 4)                # f32 epilogue temporaries headroom
        if k_tiled_:
            b += tm_ * Dout_p * 4                   # f32 accumulator scratch
        return b

    # VMEM guard: shrink tk first (the (tk, Dout_p) weight slab dominates and its
    # total HBM traffic does not depend on tk), then the row tile.
    while _vmem_budget(tm, tk) > vmem_cap and tk >= 256 and tk % 256 == 0:
        tk //= 2
    while _vmem_budget(tm, tk) > vmem_cap and tm > row_mult:
        tm = max(row_mult, _round_up(tm // 2, row_mult))

    Din_p = _round_up(Din, tk)
    k_steps = Din_p // tk
    M_p = _round_up(M, tm)
    n_row_tiles = M_p // tm
    vmem_limit = int(min(vmem_cap, max(32 * 2**20, 2 * _vmem_budget(tm, tk))))

    # ---- wrapper-side zero padding (skipped entirely when already aligned) ----
    x2 = x.reshape(M, Din)
    if M_p != M or Din_p != Din:
        x2 = jnp.pad(x2, ((0, M_p - M), (0, Din_p - Din)))
    # NOTE: in a real model the padded/transposed/cast parameters below are static
    # and should be prepared once outside the per-call hot path and reused.
    wt = weight.T
    if Din_p != Din or Dout_p != Dout:
        wt = jnp.pad(wt, ((0, Din_p - Din), (0, Dout_p - Dout)))
    wt = wt.astype(in_dtype)
    pad_o = (0, Dout_p - Dout)
    b2 = jnp.pad(bias.astype(jnp.float32), pad_o).reshape(1, Dout_p)
    g2 = jnp.pad(ln_gamma.astype(jnp.float32), pad_o).reshape(1, Dout_p)
    be2 = jnp.pad(ln_beta.astype(jnp.float32), pad_o).reshape(1, Dout_p)

    cost = pl.CostEstimate(
        flops=2 * M * Din * Dout,
        transcendentals=M,                           # one rsqrt per row
        bytes_accessed=(M_p * Din_p * itemsize
                        + (n_row_tiles if k_steps > 1 else 1) * Din_p * Dout_p * itemsize
                        + M_p * Dout_p * out_itemsize
                        + 3 * Dout_p * 4))

    if k_steps == 1:
        kernel = functools.partial(_single_k_kernel, inv_d_out=1.0 / Dout,
                                   low_precision_tail=low_precision_tail)
        out = pl.pallas_call(
            kernel,
            out_shape=jax.ShapeDtypeStruct((M_p, Dout_p), in_dtype),
            grid_spec=pltpu.PrefetchScalarGridSpec(
                num_scalar_prefetch=0,
                grid=(n_row_tiles,),
                in_specs=[
                    pl.BlockSpec((tm, Din_p), lambda i: (i, 0)),       # activations
                    pl.BlockSpec((Din_p, Dout_p), lambda i: (0, 0)),   # W^T (fetched once)
                    pl.BlockSpec((1, Dout_p), lambda i: (0, 0)),       # bias
                    pl.BlockSpec((1, Dout_p), lambda i: (0, 0)),       # LN gamma
                    pl.BlockSpec((1, Dout_p), lambda i: (0, 0)),       # LN beta
                ],
                out_specs=pl.BlockSpec((tm, Dout_p), lambda i: (i, 0)),
            ),
            compiler_params=pltpu.CompilerParams(
                dimension_semantics=("parallel",),
                vmem_limit_bytes=vmem_limit),
            cost_estimate=cost,
        )(x2, wt, b2, g2, be2)
    else:
        kernel = functools.partial(_k_tiled_kernel, inv_d_out=1.0 / Dout,
                                   low_precision_tail=low_precision_tail)
        out = pl.pallas_call(
            kernel,
            out_shape=jax.ShapeDtypeStruct((M_p, Dout_p), in_dtype),
            grid_spec=pltpu.PrefetchScalarGridSpec(
                num_scalar_prefetch=0,
                grid=(n_row_tiles, k_steps),
                in_specs=[
                    pl.BlockSpec((tm, tk), lambda i, k: (i, k)),       # activations
                    pl.BlockSpec((tk, Dout_p), lambda i, k: (k, 0)),   # W^T K slab
                    pl.BlockSpec((1, Dout_p), lambda i, k: (0, 0)),    # bias
                    pl.BlockSpec((1, Dout_p), lambda i, k: (0, 0)),    # LN gamma
                    pl.BlockSpec((1, Dout_p), lambda i, k: (0, 0)),    # LN beta
                ],
                out_specs=pl.BlockSpec((tm, Dout_p), lambda i, k: (i, 0)),
                scratch_shapes=[pltpu.VMEM((tm, Dout_p), jnp.float32)],
            ),
            compiler_params=pltpu.CompilerParams(
                dimension_semantics=("parallel", "arbitrary"),
                vmem_limit_bytes=vmem_limit),
            cost_estimate=cost,
        )(x2, wt, b2, g2, be2)

    return out[:M, :Dout].reshape(B, L, Dout)


def drop_norm_lin_ref(x, weight, bias, ln_gamma, ln_beta):
    h = jnp.einsum("bli,oi->blo", x, weight) + bias
    mean = jnp.mean(h, axis=-1, keepdims=True)
    var = jnp.mean((h - mean) ** 2, axis=-1, keepdims=True)
    hn = (h - mean) / jnp.sqrt(var + LN_EPS)
    y = hn * ln_gamma + ln_beta
    return jnp.maximum(y, 0.0)  # ReLU; Dropout(p=0) is identity


if __name__ == "__main__":
    # Small shapes consistent with the module: (batch, seq, in_features) -> out_features.
    B, L, Din, Dout = 2, 8, 32, 48
    key = jax.random.PRNGKey(0)
    kx, kw, kb = jax.random.split(key, 3)

    x = jax.random.normal(kx, (B, L, Din), dtype=jnp.float32)

    # Deterministic parameter init (PyTorch nn.Linear-style uniform bound).
    bound = 1.0 / (Din ** 0.5)
    weight = jax.random.uniform(kw, (Dout, Din), minval=-bound, maxval=bound,
                                dtype=jnp.float32)
    bias = jax.random.uniform(kb, (Dout,), minval=-bound, maxval=bound,
                              dtype=jnp.float32)
    ln_gamma = jnp.ones((Dout,), jnp.float32)   # nn.LayerNorm defaults
    ln_beta = jnp.zeros((Dout,), jnp.float32)

    y = drop_norm_lin(x, weight, bias, ln_gamma, ln_beta)
    y = jax.block_until_ready(y)

    y_ref = drop_norm_lin_ref(x, weight, bias, ln_gamma, ln_beta)
    assert y.shape == (B, L, Dout)
    assert bool(jnp.all(jnp.isfinite(y))), "non-finite output"
    assert jnp.allclose(y, y_ref, atol=1e-4, rtol=1e-4), "mismatch vs reference"
    print("KERNEL_OK")
</pallas_src>

<mosaic_0001>
module attributes {stable_mosaic.version = 11 : i64} {
  func.func @_single_k_kernel(%arg0: i32, %arg1: memref<8x128xf32, #tpu.memory_space<vmem>>, %arg2: memref<128x128xf32, #tpu.memory_space<vmem>>, %arg3: memref<1x128xf32, #tpu.memory_space<vmem>>, %arg4: memref<1x128xf32, #tpu.memory_space<vmem>>, %arg5: memref<1x128xf32, #tpu.memory_space<vmem>>, %arg6: memref<8x128xf32, #tpu.memory_space<vmem>>) attributes {dimension_semantics = [#tpu.dimension_semantics<parallel>], iteration_bounds = array<i64: 2>, scalar_prefetch = 0 : i64, scratch_operands = 0 : i64, tpu.core_type = #tpu.core_type<tc>, window_params = [{transform_indices = @transform_0, window_bounds = array<i64: 8, 128>}, {pipeline_mode = #tpu.pipeline_mode<synchronous>, transform_indices = @transform_1, window_bounds = array<i64: 128, 128>}, {pipeline_mode = #tpu.pipeline_mode<synchronous>, transform_indices = @transform_2, window_bounds = array<i64: 1, 128>}, {pipeline_mode = #tpu.pipeline_mode<synchronous>, transform_indices = @transform_3, window_bounds = array<i64: 1, 128>}, {pipeline_mode = #tpu.pipeline_mode<synchronous>, transform_indices = @transform_4, window_bounds = array<i64: 1, 128>}, {transform_indices = @transform_5, window_bounds = array<i64: 8, 128>}]} {
    %c0 = arith.constant 0 : index
    %c0_0 = arith.constant 0 : index
    %0 = vector.load %arg1[%c0, %c0_0] : memref<8x128xf32, #tpu.memory_space<vmem>>, vector<8x128xf32>
    %c0_1 = arith.constant 0 : index
    %c0_2 = arith.constant 0 : index
    %1 = vector.load %arg2[%c0_1, %c0_2] : memref<128x128xf32, #tpu.memory_space<vmem>>, vector<128x128xf32>
    %cst = arith.constant dense<0.000000e+00> : vector<8x128xf32>
    %2 = tpu.matmul %0, %1, %cst {dimension_numbers = #tpu.dot_dimension_numbers<[1], [0], [0], [1], [0, 0, 1, 1], [], []>} : vector<8x128xf32>, vector<128x128xf32>, vector<8x128xf32> -> vector<8x128xf32>
    %c0_3 = arith.constant 0 : index
    %c0_4 = arith.constant 0 : index
    %3 = vector.load %arg3[%c0_3, %c0_4] : memref<1x128xf32, #tpu.memory_space<vmem>>, vector<1x128xf32>
    %4 = vector.broadcast %3 : vector<1x128xf32> to vector<8x128xf32>
    %5 = arith.addf %2, %4 : vector<8x128xf32>
    %cst_5 = arith.constant dense<0.000000e+00> : vector<8xf32>
    %6 = vector.multi_reduction <add>, %5, %cst_5 [1] : vector<8x128xf32> to vector<8xf32>
    %7 = vector.shape_cast %6 : vector<8xf32> to vector<8x1xf32>
    %8 = arith.mulf %5, %5 : vector<8x128xf32>
    %cst_6 = arith.constant dense<0.000000e+00> : vector<8xf32>
    %9 = vector.multi_reduction <add>, %8, %cst_6 [1] : vector<8x128xf32> to vector<8xf32>
    %10 = vector.shape_cast %9 : vector<8xf32> to vector<8x1xf32>
    %cst_7 = arith.constant 0.020833334 : f32
    %11 = vector.broadcast %cst_7 : f32 to vector<8x1xf32>
    %12 = arith.mulf %7, %11 : vector<8x1xf32>
    %cst_8 = arith.constant 0.020833334 : f32
    %13 = vector.broadcast %cst_8 : f32 to vector<8x1xf32>
    %14 = arith.mulf %10, %13 : vector<8x1xf32>
    %15 = arith.mulf %12, %12 : vector<8x1xf32>
    %16 = arith.subf %14, %15 : vector<8x1xf32>
    %cst_9 = arith.constant 0.000000e+00 : f32
    %17 = vector.broadcast %cst_9 : f32 to vector<8x1xf32>
    %18 = arith.maximumf %16, %17 : vector<8x1xf32>
    %19 = vector.broadcast %12 : vector<8x1xf32> to vector<8x128xf32>
    %20 = arith.subf %5, %19 : vector<8x128xf32>
    %cst_10 = arith.constant 9.99999974E-6 : f32
    %21 = vector.broadcast %cst_10 : f32 to vector<8x1xf32>
    %22 = arith.addf %18, %21 : vector<8x1xf32>
    %23 = math.rsqrt %22 : vector<8x1xf32>
    %24 = vector.broadcast %23 : vector<8x1xf32> to vector<8x128xf32>
    %25 = arith.mulf %20, %24 : vector<8x128xf32>
    %c0_11 = arith.constant 0 : index
    %c0_12 = arith.constant 0 : index
    %26 = vector.load %arg4[%c0_11, %c0_12] : memref<1x128xf32, #tpu.memory_space<vmem>>, vector<1x128xf32>
    %c0_13 = arith.constant 0 : index
    %c0_14 = arith.constant 0 : index
    %27 = vector.load %arg5[%c0_13, %c0_14] : memref<1x128xf32, #tpu.memory_space<vmem>>, vector<1x128xf32>
    %28 = vector.broadcast %26 : vector<1x128xf32> to vector<8x128xf32>
    %29 = arith.mulf %25, %28 : vector<8x128xf32>
    %30 = vector.broadcast %27 : vector<1x128xf32> to vector<8x128xf32>
    %31 = arith.addf %29, %30 : vector<8x128xf32>
    %cst_15 = arith.constant 0.000000e+00 : f32
    %32 = vector.broadcast %cst_15 : f32 to vector<8x128xf32>
    %33 = arith.maximumf %31, %32 : vector<8x128xf32>
    %c0_16 = arith.constant 0 : index
    %c0_17 = arith.constant 0 : index
    %34 = vector.load %arg6[%c0_16, %c0_17] : memref<8x128xf32, #tpu.memory_space<vmem>>, vector<8x128xf32>
    tpu.vector_store %arg6[%c0_16, %c0_17], %33 {strides = array<i32>} : memref<8x128xf32, #tpu.memory_space<vmem>>, vector<8x128xf32>,
    return
  }
  func.func @transform_0(%arg0: i32) -> (i32, i32) {
    %c0_i32 = arith.constant 0 : i32
    %c0_i32_0 = arith.constant 0 : i32
    return %arg0, %c0_i32 : i32, i32
  }
  func.func @transform_1(%arg0: i32) -> (i32, i32) {
    %c0_i32 = arith.constant 0 : i32
    %c0_i32_0 = arith.constant 0 : i32
    %c0_i32_1 = arith.constant 0 : i32
    return %c0_i32, %c0_i32_0 : i32, i32
  }
  func.func @transform_2(%arg0: i32) -> (i32, i32) {
    %c0_i32 = arith.constant 0 : i32
    %c0_i32_0 = arith.constant 0 : i32
    %c0_i32_1 = arith.constant 0 : i32
    return %c0_i32, %c0_i32_0 : i32, i32
  }
  func.func @transform_3(%arg0: i32) -> (i32, i32) {
    %c0_i32 = arith.constant 0 : i32
    %c0_i32_0 = arith.constant 0 : i32
    %c0_i32_1 = arith.constant 0 : i32
    return %c0_i32, %c0_i32_0 : i32, i32
  }
  func.func @transform_4(%arg0: i32) -> (i32, i32) {
    %c0_i32 = arith.constant 0 : i32
    %c0_i32_0 = arith.constant 0 : i32
    %c0_i32_1 = arith.constant 0 : i32
    return %c0_i32, %c0_i32_0 : i32, i32
  }
  func.func @transform_5(%arg0: i32) -> (i32, i32) {
    %c0_i32 = arith.constant 0 : i32
    %c0_i32_0 = arith.constant 0 : i32
    return %arg0, %c0_i32 : i32, i32
  }
}

</mosaic_0001>

<bundles_post_ra>
// kernel: tpu_custom_call.1
= control target key start
LH: loop header
LB: loop body
LE: loop exit
PB: predicated region body
PF: predicated region fallthrough
CT: control target
= control target key end

     0   :  { %10 = vsyncpa [#allocation3], 0  ;;  %s1012_s0 = inlined_call_operand.hbm [shape: f32[16,128], index: 0, kind: input, shape index: {}]   ;;  %s1013_s1 = inlined_call_operand.hbm [shape: f32[128,128], index: 1, kind: input, shape index: {}]   ;;  %s1014_s2 = inlined_call_operand.vmem [shape: f32[1,128], index: 2, kind: input, shape index: {}]   ;;  %s1015_s3 = inlined_call_operand.vmem [shape: f32[1,128], index: 3, kind: input, shape index: {}]   ;;  %s1016_s4 = inlined_call_operand.vmem [shape: f32[1,128], index: 4, kind: input, shape index: {}]   ;;  %s1017_s5 = inlined_call_operand.hbm [shape: f32[16,128], index: 5, kind: output, shape index: {}]  }
   0x1   :  { %12 = vsyncpa [#allocation3 + $0x1], 0 }
   0x2   :  { %13 = vsyncpa [#allocation6], 0 }
   0x3   :  { %14 = vsyncpa [#allocation4], 0 }
   0x4   :  { %16 = vsyncpa [#allocation4 + $0x1], 0  ;;  %s800_s18 = smov 0   ;;  %s802_s19 = smov 0  }
   0x5   :  { %s804_s20 = smov 0   ;;  %s806_s21 = smov 0  }
   0x6 LB: > { %s821_s22 = sadd.s32 4294967295, %s760_s21   ;;  %s475_s23 = sadd.s32 4294967294, %s760_s21   ;;  %s760_s21 = sphi %s806_s21, %s1037_s21   ;;  %s756_s20 = sphi %s804_s20, %s1036_s20   ;;  %s752_s19 = sphi %s802_s19, %s1035_s19   ;;  %s748_s18 = sphi %s800_s18, %s1034_s18  }
   0x7   : > { %p42_p0 = scmp.ne.s32.totalorder %s752_s19, %s748_s18  ;;  %p1018_p1 = scmp.eq.s32.totalorder %s821_s22, 0 }
   0x8   : > { %p156_p3 = scmp.eq.s32.totalorder %s475_s23, 1  ;;  %p476_p5 = scmp.ge.s32.totalorder %s760_s21, 1 }
   0x9   : > { %p830_p4 = por %p1018_p1, %p42_p0  ;;  %p163_p7 = scmp.lt.s32.totalorder %s760_s21, 3 }
   0xa   : > { %p835_p6 = por %p156_p3, %p42_p0  ;;  %s762_s27 = smov [#allocation5]  }
   0xb   : > { %s1021_s24 = scalar_select %p830_p4, 1, 0 }
   0xc   : > { %s1022_s25 = scalar_select %p835_p6, 1, 0 }
   0xd   : > { %p840_p8 = pnand %p476_p5, %p163_p7  ;;  %s175_s28 = sshll.u32 %s762_s27, 4  ;;  %s844_s28 = int_to_ptr.vmem [resolvable:$true] %s175_s28 }
   0xe   : > { %s856_s30 = sadd.s32 1, %s760_s21   ;;  %s29_s6 = sadd.s32 1, %s756_s20 }
   0xf   : > { %s1023_s26 = scalar_select %p840_p8, 1, 0 }
  0x10   : > { %p576_p9 = pneg %p840_p8  ;;  %s26_s7 = ssub.s32 %s760_s21, %s856_s30 }
  0x11   : > { %s632_s10 = scalar_lea.hbm %s1013_s1, 2048 }
  0x12   : > { %p851_p11 = pnand %p576_p9, %p1018_p1  ;;  %p633_p12 = scmp.ne.s32.totalorder %s1013_s1, %s632_s10 }
  0x13   : > { %p639_p5 = scmp.lt.u32.totalorder %s632_s10, %s1013_s1 }
  0x14   : > { %p634_p13 = pneg %p851_p11 }
  0x16   : > { %p635_p0 = pnand %p634_p13, %p633_p12 }
  0x18   : > { %p636_p3 = pneg %p635_p0 }
  0x1a   : > { %p641_p7 = pnand %p639_p5, %p636_p3 }
  0x1c   : > { %644 = shalt.err (!%p641_p7)
}
  0x1d   : > { %s645_s15 = scalar_lea.vmem %s844_s28, 2048  ;;  %p653_p2 = scmp.lt.s32.totalorder %s844_s28, %s844_s28 }
  0x1e   : > { %p646_p9 = scmp.ne.s32.totalorder %s844_s28, %s645_s15  ;;  %p654_p6 = scmp.lt.s32.totalorder %s645_s15, %s645_s15 }
  0x20   : > { %p648_p10 = pnand %p646_p9, %p634_p13  ;;  %p655_p4 = por %p654_p6, %p653_p2 }
  0x22   : > { %p649_p1 = pneg %p648_p10 }
  0x24   : > { %p656_p8 = pnand %p655_p4, %p649_p1 }
  0x26   : > { %659 = shalt.err (!%p656_p8)
}
  0x27   : > { %s763_s16 = smov 128   ;;  %s764_s17 = smov 8  }
  0x28   : > { %579 = dma.hbm_to_vmem [thread:$0]  (!%p851_p11), %s1013_s1, 2048, %s844_s28, [#allocation6], %s763_s16, %s763_s16, %s764_s17  }
  0x29   : > { %p27_p2 = scmp.eq.s32.totalorder %s26_s7, 0  ;;  %p36_p1 = scmp.ne.s32.totalorder %s756_s20, %s752_s19 }
  0x2a   : > { %p37_p4 = scmp.eq.s32.totalorder %s760_s21, 0  ;;  %p589_p6 = scmp.lt.s32.totalorder %s760_s21, 2 }
  0x2b   : > { %s887_s8 = scalar_select %p27_p2, %s756_s20, %s29_s6  }
  0x2c   : > { %p38_p8 = por %p37_p4, %p36_p1  ;;  %p1025_p10 = scmp.eq.s32.totalorder %s821_s22, 1 }
  0x2d   : > { %s198_s10 = sand.u32 1, %s756_s20   ;;  %s480_s11 = sshll.u32 %s760_s21, 7 }
  0x2e   : > { %p891_p12 = por %p1025_p10, %p36_p1  ;;  %s479_s12 = sshll.u32 %s198_s10, 3 }
  0x2f   : > { %s900_s14 = scalar_lea.hbm %s1012_s0, %s480_s11  ;;  %s202_s28 = scalar_lea.vmem [#allocation2], %s479_s12 }
  0x30   : > { %s209_s6 = sshll.u32 %s202_s28, 4  ;;  %p902_p11 = pnand %p589_p6, %p38_p8  ;;  %s906_s6 = int_to_ptr.vmem [resolvable:$true] %s209_s6 }
  0x31   : > { %s199_s15 = scalar_lea.sflag [#allocation3], %s198_s10  ;;  %s660_s16 = scalar_lea.hbm %s900_s14, 128 }
  0x32   : > { %p661_p13 = scmp.ne.s32.totalorder %s900_s14, %s660_s16  ;;  %p662_p0 = pneg %p902_p11 }
  0x33   : > { %s665_s27 = scalar_lea.hbm %s1012_s0, 256  ;;  %p666_p7 = scmp.lt.u32.totalorder %s900_s14, %s1012_s0 }
  0x34   : > { %p663_p3 = pnand %p662_p0, %p661_p13  ;;  %p667_p9 = scmp.lt.u32.totalorder %s665_s27, %s660_s16 }
  0x35   : > { %p669_p1 = scmp.lt.u32.totalorder %s660_s16, %s900_s14 }
  0x36   : > { %p664_p5 = pneg %p663_p3  ;;  %p668_p2 = por %p667_p9, %p666_p7 }
  0x38   : > { %p670_p4 = por %p669_p1, %p668_p2 }
  0x3a   : > { %p671_p6 = pnand %p670_p4, %p664_p5 }
  0x3c   : > { %674 = shalt.err (!%p671_p6)
}
  0x3d   : > { %s675_s10 = scalar_lea.vmem %s906_s6, 128  ;;  %s765_s29 = smov [#allocation2]  }
  0x3e   : > { %p676_p8 = scmp.ne.s32.totalorder %s906_s6, %s675_s10  ;;  %s680_s13 = sshll.u32 %s765_s29, 4  ;;  %s681_s13 = int_to_ptr.vmem [resolvable:$false] %s680_s13 }
  0x3f   : > { %s682_s28 = scalar_lea.vmem %s681_s13, 256  ;;  %p683_p3 = scmp.lt.s32.totalorder %s906_s6, %s681_s13 }
  0x40   : > { %p678_p10 = pnand %p676_p8, %p662_p0  ;;  %p684_p7 = scmp.lt.s32.totalorder %s682_s28, %s675_s10 }
  0x42   : > { %p679_p13 = pneg %p678_p10  ;;  %p685_p9 = por %p684_p7, %p683_p3 }
  0x44   : > { %p686_p2 = pnand %p685_p9, %p679_p13 }
  0x46   : > { %689 = shalt.err (!%p686_p2)
}
  0x47   : > { %583 = dma.hbm_to_vmem [thread:$0]  (!%p902_p11), %s900_s14, 128, %s906_s6, %s199_s15  }
  0x48   : > { %p1028_p5 = scmp.ne.s32.totalorder %s1023_s26, 0 }
  0x49   : > { %s936_s16 = sand.u32 (!%p1028_p5), 1, %s752_s19   ;;  %p1029_p0 = scmp.ne.s32.totalorder (!%p1028_p5), %s1021_s24, 0 }
  0x4a   : > { %218 = sbr.rel (%p1028_p5) target bundleno = 520 (0x208), region = 40  ;;  %s482_s17 = sshll.u32 (!%p1028_p5), %s936_s16, 3 }
  0x4b   : > { %s221_s23 = scalar_lea.sflag (!%p1028_p5), [#allocation3], %s936_s16  ;;  %s942_s27 = scalar_lea.vmem (!%p1028_p5), [#allocation2], %s482_s17 }
  0x51   : > { %735 = dma.done.wait (%p1029_p0), %s221_s23, 128  }
  0x52   : > { %737 = vsyncadd (%p1029_p0), %s221_s23, 4294967168  ;;  %p1030_p11 = scmp.eq.s32.totalorder %s821_s22, 0 }
  0x54   : > { %739 = dma.done.wait (%p1030_p11), [#allocation6], 2048   ;;  %p1031_p1 = pmov %p1030_p11 }
  0x55   : > { %v766_v0 = vmov 0.0|0.0   ;;  %vm767_vm0 = vmmov 0   ;;  %v768_v1 = vmov 0.0   ;;  %v256_v2 = vld [vmem:[#allocation5] sm:$0xff]  ;;  %v257_v3 = vld [vmem:[#allocation5 + $0x8] sm:$0xff]  ;;  %v258_v4 = vld [vmem:[#allocation5 + $0x10] sm:$0xff] }
  0x56   : > { %741 = vsyncadd (%p1031_p1), [#allocation6], 4294965248  ;;  %544 = vmatprep.subr.bf16.mxu0 %v766_v0  ;;  %541 = vmatprep.mubr.msk.f32.mxu0 %vm767_vm0, %v768_v1  ;;  %v545_v5 = vpack.c.bf16 %v257_v3, %v256_v2  ;;  %v259_v6 = vld [vmem:[#allocation5 + $0x18] sm:$0xff]  ;;  %v260_v8 = vld [vmem:[#allocation5 + $0x20] sm:$0xff]  ;;  %s489_s11 = sshll.u32 %s821_s22, 7  ;;  %s254_s12 = scalar_lea.vmem [#allocation7], %s482_s17 }
  0x57   : > { %v548_v7 = vpack.c.bf16 %v259_v6, %v258_v4  ;;  %v261_v9 = vld [vmem:[#allocation5 + $0x28] sm:$0xff]  ;;  %v262_v11 = vld [vmem:[#allocation5 + $0x30] sm:$0xff]  ;;  %v263_v12 = vld [vmem:[#allocation5 + $0x38] sm:$0xff]  ;;  %s395_s10 = sshll.u32 %s254_s12, 4  ;;  %s968_s28 = scalar_lea.hbm %s1017_s5, %s489_s11  ;;  %s970_s10 = int_to_ptr.vmem [resolvable:$true] %s395_s10 }
  0x58   : > { %546 = vmatpush3.bf16.msra.mxu0 %v545_v5  ;;  %v551_v10 = vpack.c.bf16 %v261_v9, %v260_v8  ;;  %v554_v13 = vpack.c.bf16 %v263_v12, %v262_v11  ;;  %v264_v14 = vld [vmem:[#allocation5 + $0x40] sm:$0xff]  ;;  %v265_v15 = vld [vmem:[#allocation5 + $0x48] sm:$0xff]  ;;  %v266_v17 = vld [vmem:[#allocation5 + $0x50] sm:$0xff]  ;;  %s382_s23 = scalar_lea.sflag [#allocation4], %s936_s16  ;;  %s769_s22 = smov [#allocation7]  }
  0x59   : > { %547 = vmatprep.subr.bf16.mxu0 %v766_v0  ;;  %v557_v16 = vpack.c.bf16 %v265_v15, %v264_v14  ;;  %v267_v18 = vld [vmem:[#allocation5 + $0x58] sm:$0xff]  ;;  %v268_v20 = vld [vmem:[#allocation5 + $0x60] sm:$0xff]  ;;  %v269_v21 = vld [vmem:[#allocation5 + $0x68] sm:$0xff]  ;;  %s694_s17 = sshll.u32 %s769_s22, 4  ;;  %s695_s17 = int_to_ptr.vmem [resolvable:$false] %s694_s17 }
  0x5a   : > { %v560_v19 = vpack.c.bf16 %v267_v18, %v266_v17  ;;  %v563_v22 = vpack.c.bf16 %v269_v21, %v268_v20  ;;  %v270_v23 = vld [vmem:[#allocation5 + $0x70] sm:$0xff]  ;;  %v271_v24 = vld [vmem:[#allocation5 + $0x78] sm:$0xff]  ;;  %s696_s24 = scalar_lea.vmem %s695_s17, 256  ;;  %p697_p10 = scmp.lt.s32.totalorder %s970_s10, %s695_s17 }
  0x5b   : > { %v566_v25 = vpack.c.bf16 %v271_v24, %v270_v23  ;;  %v255_v26 = vld [vmem:[%s942_s27] sm:$0xff]  ;;  %s690_s27 = scalar_lea.vmem %s970_s10, 128 }
  0x5c   : > { %549 = vmatpush3.bf16.msra.mxu0 %v548_v7  ;;  %v485_v27 = vld [vmem:[%s1014_s2] ss:$0 sm:$0xff]  ;;  %p691_p4 = scmp.ne.s32.totalorder %s970_s10, %s690_s27  ;;  %p698_p13 = scmp.lt.s32.totalorder %s696_s24, %s690_s27 }
  0x5d   : > { %550 = vmatprep.subr.bf16.mxu0 %v766_v0  ;;  %v486_v42 = vld [vmem:[%s1015_s3] ss:$0 sm:$0xff] }
  0x5e   : > { %v487_v44 = vld [vmem:[%s1016_s4] ss:$0 sm:$0xff]  ;;  %p692_p6 = pnand %p691_p4, %p891_p12  ;;  %p699_p3 = por %p698_p13, %p697_p10 }
  0x60   : > { %552 = vmatpush3.bf16.msra.mxu0 %v551_v10  ;;  %p693_p8 = pneg %p692_p6 }
  0x61   : > { %553 = vmatprep.subr.bf16.mxu0 %v766_v0 }
  0x62   : > { %p700_p7 = pnand %p699_p3, %p693_p8 }
  0x64   : > { %555 = vmatpush3.bf16.msra.mxu0 %v554_v13 }
  0x65   : > { %556 = vmatprep.subr.bf16.mxu0 %v766_v0 }
  0x68   : > { %558 = vmatpush3.bf16.msra.mxu0 %v557_v16 }
  0x69   : > { %559 = vmatprep.subr.bf16.mxu0 %v766_v0 }
  0x6c   : > { %561 = vmatpush3.bf16.msra.mxu0 %v560_v19 }
  0x6d   : > { %562 = vmatprep.subr.bf16.mxu0 %v766_v0 }
  0x70   : > { %564 = vmatpush3.bf16.msra.mxu0 %v563_v22 }
  0x71   : > { %565 = vmatprep.subr.bf16.mxu0 %v766_v0 }
  0x74   : > { %567 = vmatpush3.bf16.msra.mxu0 %v566_v25 }
  0x77   : > { %542 = vmatmul.mubr.f32.vlgmr.msra.gmra.mrb[0].mxu0 %v255_v26 }
 0x14a   : > { %v345_v28 = vpop.f32.mrb[0].mxu0 }
 0x14b   : > { %v346_v29 = vadd.f32 %v485_v27, %v345_v28  ;;  %v543_v30 = vpop.f32.mrb[1].mxu0 }
 0x14d   : > { %349 = vadd.xlane.f32.xlu0 %v346_v29  ;;  %v351_v31 = vmul.f32 %v346_v29, %v346_v29 }
 0x151   : > { %352 = vadd.xlane.f32.xlu0 %v351_v31 }
 0x1da   : > { %v350_v32 = vpop.xlane.xlu0 %349 }
 0x1db   : > { %v354_v33 = vmul.f32 0.020833334, %v350_v32 }
 0x1dd   : > { %v356_v35 = vmul.f32 %v354_v33, %v354_v33  ;;  %v359_v40 = vsub.f32 %v346_v29, %v354_v33 }
 0x1de   : > { %v353_v34 = vpop.xlane.xlu0 %352 }
 0x1df   : > { %v355_v36 = vmul.f32 0.020833334, %v353_v34 }
 0x1e1   : > { %v357_v37 = vsub.f32 %v355_v36, %v356_v35 }
 0x1e3   : > { %v358_v38 = vmax.f32 %v357_v37, 0.0 }
 0x1e5   : > { %v360_v39 = vadd.f32 1e-05, %v358_v38 }
 0x1e7   : > { %630 = vrsqrt.f32 %v360_v39 }
 0x1f1   : > { %v631_v41 = vpop.eup %630 }
 0x1f2   : > { %v362_v43 = vmul.f32 %v631_v41, %v359_v40 }
 0x1f4   : > { %v371_v45 = vmul.f32 %v486_v42, %v362_v43 }
 0x1f6   : > { %v378_v46 = vadd.f32 %v487_v44, %v371_v45 }
 0x1f8   : > { %v379_v47 = vmax.f32 %v378_v46, 0.0 }
 0x1fa   : > { %380 = vst [vmem:[%s254_s12] sm:$0xff] %v379_v47 }
 0x1fb   : > { %703 = shalt.err (!%p700_p7)
}
 0x1fc   : > { %s704_s16 = scalar_lea.hbm %s968_s28, 128  ;;  %s708_s6 = scalar_lea.hbm %s1017_s5, 256 }
 0x1fd   : > { %p705_p9 = scmp.ne.s32.totalorder %s968_s28, %s704_s16  ;;  %p709_p0 = scmp.lt.u32.totalorder %s968_s28, %s1017_s5 }
 0x1fe   : > { %p710_p11 = scmp.lt.u32.totalorder %s708_s6, %s704_s16  ;;  %p712_p4 = scmp.lt.u32.totalorder %s704_s16, %s968_s28 }
 0x1ff   : > { %p706_p2 = pnand %p705_p9, %p891_p12 }
 0x200   : > { %p711_p1 = por %p710_p11, %p709_p0 }
 0x201   : > { %p707_p5 = pneg %p706_p2 }
 0x202   : > { %p713_p6 = por %p712_p4, %p711_p1 }
 0x204   : > { %p714_p8 = pnand %p713_p6, %p707_p5 }
 0x206   : > { %717 = shalt.err (!%p714_p8)
}
 0x207   : > { %574 = dma.vmem_to_hbm [thread:$0]  (%p891_p12), %s970_s10, 128, %s968_s28, %s382_s23  }
 0x208 PF: > { %s407_s11 = sand.u32 1, %s748_s18   ;;  %p1032_p10 = scmp.ne.s32.totalorder %s1022_s25, 0 }
 0x209   : > { %p1033_p13 = scmp.ge.s32.totalorder %s760_s21, 2  ;;  %s408_s12 = scalar_lea.sflag [#allocation4], %s407_s11 }
 0x20b   : > { %p585_p3 = pnand %p1033_p13, %p1032_p10 }
 0x20d   : > { %743 = dma.done.wait (!%p585_p3), %s408_s12, 128  }
 0x20e   : > { %745 = vsyncadd (!%p585_p3), %s408_s12, 4294967168  ;;  %p19_p7 = scmp.ge.s32.totalorder %s856_s30, 4   ;;  %s1034_s18 = smov %s752_s19 }
 0x20f   : > { %s1035_s19 = smov %s756_s20  ;;  %s1036_s20 = smov %s887_s8 }
 0x210   : > { %s1037_s21 = smov %s856_s30  ;;  %21 = sbr.rel (!%p19_p7) target bundleno = 6 (0x6), region = 89 }
 0x217   :  { %413 = vsyncpa [#allocation3], 1 }
 0x218   :  { %415 = vsyncpa [#allocation3 + $0x1], 1 }
 0x219   :  { %416 = vsyncpa [#allocation6], 1 }
 0x21a   :  { %417 = vsyncpa [#allocation4], 1 }
 0x21b   :  { %419 = vsyncpa [#allocation4 + $0x1], 1 }

</bundles_post_ra>
